<compile_context>
chip_gen: v7x
topology: tpu7x:2x2x1
jax: 0.10.0
libtpu: 0.0.40
codegen_flags: <defaults>
</compile_context>

<pallas_src>
import jax
import jax.numpy as jnp
from jax.experimental import pallas as pl
from jax.experimental.pallas import tpu as pltpu

WINDOW_SIZES = (1, 2, 3)          # matches the module default
MAX_W = max(WINDOW_SIZES)
N_WIN = len(WINDOW_SIZES)


def desc2vec_cnn_kernel(x_ref, wbig_ref, bbig_ref, wfc_ref, bfc_ref, out_ref):
    """One grid step processes a (Bt, L, C) batch tile entirely in VMEM.

    x_ref    : (Bt, L, C)            f32 sequence tile (batch, position, channel)
    wbig_ref : (MAX_W*C, N_WIN*O)    bf16 fused conv weights (zero-padded taps)
    bbig_ref : (1, N_WIN*O)          f32 concatenated conv biases
    wfc_ref  : (N_WIN*O, O)          bf16 fc weight (already transposed)
    bfc_ref  : (1, O)                f32 fc bias
    out_ref  : (Bt, O)
    """
    x = x_ref[...]                                   # (Bt, L, C) f32
    Bt, L, C = x.shape

    # Circular im2col: tap k at position l reads x[(l + k) % L].
    # pltpu.roll == jnp.roll semantics; shift (L - k) % L ≡ shift -k.
    taps = [x]
    for k in range(1, MAX_W):
        taps.append(pltpu.roll(x, shift=(L - k) % L, axis=1))
    x_big = jnp.concatenate(taps, axis=-1).reshape(Bt * L, MAX_W * C)

    # Single fused MXU matmul covering every tap of every window size.
    y = jnp.dot(x_big.astype(wbig_ref.dtype), wbig_ref[...],
                preferred_element_type=jnp.float32)          # (Bt*L, N_WIN*O)
    y = y + bbig_ref[...]                                    # per-window bias (f32)
    y = jnp.maximum(y, 0.0)                                  # activation = ReLU
    pooled = jnp.max(y.reshape(Bt, L, -1), axis=1)           # MaxPool1d over full L

    # TODO(synk): nn.Dropout is identity in eval mode; training-mode dropout not implemented.
    out = jnp.dot(pooled.astype(wfc_ref.dtype), wfc_ref[...],
                  preferred_element_type=jnp.float32)        # (Bt, O)
    out_ref[...] = (out + bfc_ref[...]).astype(out_ref.dtype)


def desc2vec_cnn(x, conv_weights, conv_biases, fc_weight, fc_bias,
                 *, batch_tile=8, mxu_dtype=jnp.bfloat16):
    """x: (B, L, C) float32  (== PyTorch input before .permute(0,2,1))
    conv_weights[i]: (O, C, w_i)  (PyTorch Conv1d layout)
    conv_biases[i] : (O,)
    fc_weight      : (O, N_WIN*O) (PyTorch Linear layout)
    fc_bias        : (O,)
    """
    B, L, C = x.shape
    O = fc_weight.shape[0]

    # Fused block weight: rows = tap-k channel block, cols = window-j output block.
    # Taps beyond a window's kernel size stay exactly zero (bias added separately).
    wbig = jnp.zeros((MAX_W * C, N_WIN * O), jnp.float32)
    for j, (wsize, Wj) in enumerate(zip(WINDOW_SIZES, conv_weights)):
        for k in range(wsize):
            wbig = wbig.at[k * C:(k + 1) * C, j * O:(j + 1) * O].set(Wj[:, :, k].T)
    bbig = jnp.concatenate([b.reshape(O) for b in conv_biases]).reshape(1, N_WIN * O)

    x = x.astype(jnp.float32)
    wbig = wbig.astype(mxu_dtype)
    bbig = bbig.astype(jnp.float32)
    wfc = fc_weight.T.astype(mxu_dtype)                      # (N_WIN*O, O)
    bfc = fc_bias.reshape(1, O).astype(jnp.float32)

    # Batch tiling: one block if the batch is small, else 8-row tiles (pad + slice).
    Bt = B if B <= batch_tile else batch_tile
    Bp = -(-B // Bt) * Bt
    if Bp != B:
        x = jnp.pad(x, ((0, Bp - B), (0, 0), (0, 0)))

    flops = 2 * Bp * L * (MAX_W * C) * (N_WIN * O) + 2 * Bp * (N_WIN * O) * O
    bytes_accessed = (x.size * 4 + wbig.size * wbig.dtype.itemsize + bbig.size * 4
                      + wfc.size * wfc.dtype.itemsize + bfc.size * 4 + Bp * O * 4)

    out = pl.pallas_call(
        desc2vec_cnn_kernel,
        out_shape=jax.ShapeDtypeStruct((Bp, O), jnp.float32),
        grid_spec=pltpu.PrefetchScalarGridSpec(
            num_scalar_prefetch=0,
            grid=(Bp // Bt,),
            in_specs=[
                pl.BlockSpec((Bt, L, C), lambda i: (i, 0, 0)),               # x tile
                pl.BlockSpec((MAX_W * C, N_WIN * O), lambda i: (0, 0)),      # W_big (resident)
                pl.BlockSpec((1, N_WIN * O), lambda i: (0, 0)),              # conv biases
                pl.BlockSpec((N_WIN * O, O), lambda i: (0, 0)),              # W_fc
                pl.BlockSpec((1, O), lambda i: (0, 0)),                      # fc bias
            ],
            out_specs=pl.BlockSpec((Bt, O), lambda i: (i, 0)),
        ),
        compiler_params=pltpu.CompilerParams(dimension_semantics=("parallel",)),
        cost_estimate=pl.CostEstimate(flops=int(flops), transcendentals=0,
                                      bytes_accessed=int(bytes_accessed)),
    )(x, wbig, bbig, wfc, bfc)
    return out[:B]


def reference(x, conv_weights, conv_biases, fc_weight, fc_bias):
    """Pure-JAX f32 reference mirroring the PyTorch forward (eval mode, ReLU act)."""
    B, L, C = x.shape
    feats = []
    for W, b, w in zip(conv_weights, conv_biases, WINDOW_SIZES):
        out = jnp.zeros((B, L, W.shape[0]), jnp.float32)
        for k in range(w):
            xk = jnp.roll(x, -k, axis=1)                      # circular indexing
            out = out + jnp.einsum('blc,oc->blo', xk, W[:, :, k])
        out = jax.nn.relu(out + b[None, None, :])
        feats.append(jnp.max(out, axis=1))                    # maxpool over full L
    allf = jnp.concatenate(feats, axis=-1)
    return allf @ fc_weight.T + fc_bias[None, :]


if __name__ == "__main__":
    key = jax.random.PRNGKey(0)
    B, L = 2, 8                       # small sampledDescWordNumMax for the test
    in_feat = out_feat = 32           # fc requires concat width == in_feat*3 -> in_feat == out_feat

    keys = jax.random.split(key, 9)
    x = jax.random.normal(keys[0], (B, L, in_feat), jnp.float32)

    conv_weights, conv_biases = [], []
    for i, w in enumerate(WINDOW_SIZES):
        conv_weights.append(0.1 * jax.random.normal(keys[1 + 2 * i], (out_feat, in_feat, w), jnp.float32))
        conv_biases.append(0.1 * jax.random.normal(keys[2 + 2 * i], (out_feat,), jnp.float32))
    fc_weight = 0.1 * jax.random.normal(keys[7], (out_feat, in_feat * N_WIN), jnp.float32)
    fc_bias = 0.1 * jax.random.normal(keys[8], (out_feat,), jnp.float32)

    out = desc2vec_cnn(x, conv_weights, conv_biases, fc_weight, fc_bias)
    out = jax.block_until_ready(out)

    ref = reference(x, conv_weights, conv_biases, fc_weight, fc_bias)
    assert out.shape == (B, out_feat)
    # bf16 MXU operands (f32 accumulation) -> loosened tolerance vs the f32 reference.
    assert jnp.allclose(out, ref, atol=5e-2, rtol=5e-2), float(jnp.max(jnp.abs(out - ref)))
    print("KERNEL_OK")
</pallas_src>

<mosaic_0001>
module attributes {stable_mosaic.version = 11 : i64} {
  func.func @desc2vec_cnn_kernel(%arg0: i32, %arg1: memref<2x8x32xf32, #tpu.memory_space<vmem>>, %arg2: memref<96x96xbf16, #tpu.memory_space<vmem>>, %arg3: memref<1x96xf32, #tpu.memory_space<vmem>>, %arg4: memref<96x32xbf16, #tpu.memory_space<vmem>>, %arg5: memref<1x32xf32, #tpu.memory_space<vmem>>, %arg6: memref<2x32xf32, #tpu.memory_space<vmem>>) attributes {dimension_semantics = [#tpu.dimension_semantics<parallel>], iteration_bounds = array<i64: 1>, scalar_prefetch = 0 : i64, scratch_operands = 0 : i64, tpu.core_type = #tpu.core_type<tc>, window_params = [{transform_indices = @transform_0, window_bounds = array<i64: 2, 8, 32>}, {pipeline_mode = #tpu.pipeline_mode<synchronous>, transform_indices = @transform_1, window_bounds = array<i64: 96, 96>}, {pipeline_mode = #tpu.pipeline_mode<synchronous>, transform_indices = @transform_2, window_bounds = array<i64: 1, 96>}, {pipeline_mode = #tpu.pipeline_mode<synchronous>, transform_indices = @transform_3, window_bounds = array<i64: 96, 32>}, {pipeline_mode = #tpu.pipeline_mode<synchronous>, transform_indices = @transform_4, window_bounds = array<i64: 1, 32>}, {transform_indices = @transform_5, window_bounds = array<i64: 2, 32>}]} {
    %c0 = arith.constant 0 : index
    %c0_0 = arith.constant 0 : index
    %c0_1 = arith.constant 0 : index
    %0 = vector.load %arg1[%c0, %c0_0, %c0_1] : memref<2x8x32xf32, #tpu.memory_space<vmem>>, vector<2x8x32xf32>
    %c7_i32 = arith.constant 7 : i32
    %1 = tpu.dynamic_rotate %0 by %c7_i32 dim 1 : vector<2x8x32xf32>, i32 -> vector<2x8x32xf32>
    %c6_i32 = arith.constant 6 : i32
    %2 = tpu.dynamic_rotate %0 by %c6_i32 dim 1 : vector<2x8x32xf32>, i32 -> vector<2x8x32xf32>
    %3 = tpu.concatenate %0, %1, %2 in 2 : vector<2x8x32xf32>, vector<2x8x32xf32>, vector<2x8x32xf32> -> vector<2x8x96xf32>
    %4 = vector.shape_cast %3 : vector<2x8x96xf32> to vector<16x96xf32>
    %5 = arith.truncf %4 : vector<16x96xf32> to vector<16x96xbf16>
    %c0_2 = arith.constant 0 : index
    %c0_3 = arith.constant 0 : index
    %6 = vector.load %arg2[%c0_2, %c0_3] : memref<96x96xbf16, #tpu.memory_space<vmem>>, vector<96x96xbf16>
    %cst = arith.constant dense<0.000000e+00> : vector<16x96xf32>
    %7 = tpu.matmul %5, %6, %cst {dimension_numbers = #tpu.dot_dimension_numbers<[1], [0], [0], [1], [0, 0, 1, 1], [], []>} : vector<16x96xbf16>, vector<96x96xbf16>, vector<16x96xf32> -> vector<16x96xf32>
    %c0_4 = arith.constant 0 : index
    %c0_5 = arith.constant 0 : index
    %8 = vector.load %arg3[%c0_4, %c0_5] : memref<1x96xf32, #tpu.memory_space<vmem>>, vector<1x96xf32>
    %9 = vector.broadcast %8 : vector<1x96xf32> to vector<16x96xf32>
    %10 = arith.addf %7, %9 : vector<16x96xf32>
    %cst_6 = arith.constant 0.000000e+00 : f32
    %11 = vector.broadcast %cst_6 : f32 to vector<16x96xf32>
    %12 = arith.maximumf %10, %11 : vector<16x96xf32>
    %13 = vector.shape_cast %12 : vector<16x96xf32> to vector<2x8x96xf32>
    %cst_7 = arith.constant dense<0xFF800000> : vector<2x96xf32>
    %14 = vector.multi_reduction <maximumf>, %13, %cst_7 [1] : vector<2x8x96xf32> to vector<2x96xf32>
    %15 = arith.truncf %14 : vector<2x96xf32> to vector<2x96xbf16>
    %c0_8 = arith.constant 0 : index
    %c0_9 = arith.constant 0 : index
    %16 = vector.load %arg4[%c0_8, %c0_9] : memref<96x32xbf16, #tpu.memory_space<vmem>>, vector<96x32xbf16>
    %cst_10 = arith.constant dense<0.000000e+00> : vector<2x32xf32>
    %17 = tpu.matmul %15, %16, %cst_10 {dimension_numbers = #tpu.dot_dimension_numbers<[1], [0], [0], [1], [0, 0, 1, 1], [], []>} : vector<2x96xbf16>, vector<96x32xbf16>, vector<2x32xf32> -> vector<2x32xf32>
    %c0_11 = arith.constant 0 : index
    %c0_12 = arith.constant 0 : index
    %18 = vector.load %arg5[%c0_11, %c0_12] : memref<1x32xf32, #tpu.memory_space<vmem>>, vector<1x32xf32>
    %19 = vector.broadcast %18 : vector<1x32xf32> to vector<2x32xf32>
    %20 = arith.addf %17, %19 : vector<2x32xf32>
    %c0_13 = arith.constant 0 : index
    %c0_14 = arith.constant 0 : index
    %21 = vector.load %arg6[%c0_13, %c0_14] : memref<2x32xf32, #tpu.memory_space<vmem>>, vector<2x32xf32>
    tpu.vector_store %arg6[%c0_13, %c0_14], %20 {strides = array<i32>} : memref<2x32xf32, #tpu.memory_space<vmem>>, vector<2x32xf32>,
    return
  }
  func.func @transform_0(%arg0: i32) -> (i32, i32, i32) {
    %c0_i32 = arith.constant 0 : i32
    %c0_i32_0 = arith.constant 0 : i32
    %c0_i32_1 = arith.constant 0 : i32
    return %arg0, %c0_i32, %c0_i32_0 : i32, i32, i32
  }
  func.func @transform_1(%arg0: i32) -> (i32, i32) {
    %c0_i32 = arith.constant 0 : i32
    %c0_i32_0 = arith.constant 0 : i32
    %c0_i32_1 = arith.constant 0 : i32
    return %c0_i32, %c0_i32_0 : i32, i32
  }
  func.func @transform_2(%arg0: i32) -> (i32, i32) {
    %c0_i32 = arith.constant 0 : i32
    %c0_i32_0 = arith.constant 0 : i32
    %c0_i32_1 = arith.constant 0 : i32
    return %c0_i32, %c0_i32_0 : i32, i32
  }
  func.func @transform_3(%arg0: i32) -> (i32, i32) {
    %c0_i32 = arith.constant 0 : i32
    %c0_i32_0 = arith.constant 0 : i32
    %c0_i32_1 = arith.constant 0 : i32
    return %c0_i32, %c0_i32_0 : i32, i32
  }
  func.func @transform_4(%arg0: i32) -> (i32, i32) {
    %c0_i32 = arith.constant 0 : i32
    %c0_i32_0 = arith.constant 0 : i32
    %c0_i32_1 = arith.constant 0 : i32
    return %c0_i32, %c0_i32_0 : i32, i32
  }
  func.func @transform_5(%arg0: i32) -> (i32, i32) {
    %c0_i32 = arith.constant 0 : i32
    %c0_i32_0 = arith.constant 0 : i32
    return %arg0, %c0_i32 : i32, i32
  }
}

</mosaic_0001>

<bundles_post_ra>
// kernel: tpu_custom_call.1
= control target key start
LH: loop header
LB: loop body
LE: loop exit
PB: predicated region body
PF: predicated region fallthrough
CT: control target
= control target key end

     0   :  { %v403_v7 = vmov 0.0   ;;  %s404_s26 = smov 32   ;;  %vm405_vm0 = vmmov 0   ;;  %s406_s30 = smov 64   ;;  %s502_s0 = inlined_call_operand.vmem [shape: f32[2,8,32], index: 0, kind: input, shape index: {}]   ;;  %s503_s1 = inlined_call_operand.vmem [shape: bf16[96,96], index: 1, kind: input, shape index: {}]   ;;  %s504_s2 = inlined_call_operand.vmem [shape: f32[1,96], index: 2, kind: input, shape index: {}]   ;;  %s505_s3 = inlined_call_operand.vmem [shape: bf16[96,32], index: 3, kind: input, shape index: {}]   ;;  %s506_s4 = inlined_call_operand.vmem [shape: f32[1,32], index: 4, kind: input, shape index: {}]   ;;  %s507_s5 = inlined_call_operand.hbm [shape: f32[2,32], index: 5, kind: output, shape index: {}]  }
   0x1   :  { %v22_v0 = vld [vmem:[%s502_s0] sm:$0xff]  ;;  %v23_v1 = vld [vmem:[%s502_s0 + $0x8] sm:$0xff]  ;;  %320 = vmatprep.subr.bf16.mxu0 %v403_v7  ;;  %336 = vmatprep.subr.bf16.mxu1 %v403_v7  ;;  %v369_v11 = vld [vmem:[%s503_s1 + $0x10] sm:$0xff]  }
   0x2   :  { %v367_v2 = vld [vmem:[%s503_s1] sm:$0xff]   ;;  %v24_v3 = vrot.slane %v22_v0, 1  ;;  %v25_v4 = vrot.slane %v23_v1, 1  ;;  %v26_v5 = vrot.slane %v22_v0, 2  ;;  %v27_v6 = vrot.slane %v23_v1, 2  ;;  %v368_v9 = vld [vmem:[%s503_s1 + $0x8] sm:$0xff]   ;;  %332 = vmatprep.mubr.msk.bf16.mxu0 %vm405_vm0, %v403_v7  ;;  %348 = vmatprep.mubr.msk.bf16.mxu1 %vm405_vm0, %v403_v7 }
   0x3   :  { %321 = vmatpush3.bf16.msra.mxu0 %v367_v2  ;;  %v370_v12 = vld [vmem:[%s503_s1 + $0x18] sm:$0xff]  }
   0x4   :  { %v357_v8 = vpack.i.bf16 %v25_v4, %v24_v3  ;;  %322 = vmatprep.subr.bf16.mxu0 %v403_v7  ;;  %v362_v10 = vpack.i.bf16 %v27_v6, %v26_v5 }
   0x6   :  { %358 = vrot.lane.b32.xlu0 %v357_v8, %s404_s26 }
   0x7   :  { %323 = vmatpush3.bf16.msra.mxu0 %v368_v9 }
   0x8   :  { %324 = vmatprep.subr.bf16.mxu0 %v403_v7 }
   0xa   :  { %363 = vrot.lane.b32.xlu0 %v362_v10, %s406_s30 }
   0xb   :  { %325 = vmatpush3.bf16.msra.mxu0 %v369_v11 }
   0xc   :  { %326 = vmatprep.subr.bf16.mxu0 %v403_v7 }
   0xd   :  { %10 = vsyncpa [#allocation3], 0  ;;  %v371_v13 = vld [vmem:[%s503_s1 + $0x20] sm:$0xff]   ;;  %v372_v14 = vld [vmem:[%s503_s1 + $0x28] sm:$0xff]   ;;  %vm44_vm1 = vcmask 261120   ;;  %vm47_vm2 = vcmask 523264  }
   0xe   :  { %vm106_vm3 = vcmask 785408   ;;  %v373_v26 = vld [vmem:[%s505_s3] sm:$0xff]   ;;  %v374_v27 = vld [vmem:[%s505_s3 + $0x8] sm:$0xff]   ;;  %v375_v28 = vld [vmem:[%s505_s3 + $0x10] sm:$0xff]   ;;  %vm192_vm4 = vcmask 1041409   ;;  %s407_s23 = smov [#allocation2]  }
   0xf   :  { %327 = vmatpush3.bf16.msra.mxu0 %v370_v12  ;;  %337 = vmatpush3.bf16.msra.mxu1 %v373_v26  ;;  %v376_v29 = vld [vmem:[%s505_s3 + $0x18] sm:$0xff]   ;;  %v377_v30 = vld [vmem:[%s505_s3 + $0x20] sm:$0xff]   ;;  %v378_v31 = vld [vmem:[%s505_s3 + $0x28] sm:$0xff]   ;;  %s282_s24 = sshll.u32 %s407_s23, 4  ;;  %vm274_vm5 = vcmask 254976   ;;  %s283_s24 = int_to_ptr.vmem [resolvable:$true] %s282_s24 }
  0x10   :  { %328 = vmatprep.subr.bf16.mxu0 %v403_v7  ;;  %338 = vmatprep.subr.bf16.mxu1 %v403_v7  ;;  %v290_v32 = vld [vmem:[%s504_s2] ss:$0 sm:$0xff]  ;;  %s379_s25 = scalar_lea.vmem %s283_s24, 32  ;;  %p384_p1 = scmp.lt.s32.totalorder %s283_s24, %s283_s24 }
  0x11   :  { %v298_v61 = vld [vmem:[%s506_s4] ss:$0 sm:$0xff]  ;;  %p380_p0 = scmp.ne.s32.totalorder %s283_s24, %s379_s25  ;;  %p385_p2 = scmp.lt.s32.totalorder %s379_s25, %s379_s25 }
  0x13   :  { %329 = vmatpush3.bf16.msra.mxu0 %v371_v13  ;;  %339 = vmatpush3.bf16.msra.mxu1 %v374_v27  ;;  %p386_p3 = por %p385_p2, %p384_p1 }
  0x14   :  { %330 = vmatprep.subr.bf16.mxu0 %v403_v7  ;;  %340 = vmatprep.subr.bf16.mxu1 %v403_v7 }
  0x15   :  { %p387_p4 = pnand %p386_p3, %p380_p0 }
  0x17   :  { %331 = vmatpush3.bf16.msra.mxu0 %v372_v14  ;;  %341 = vmatpush3.bf16.msra.mxu1 %v375_v28 }
  0x18   :  { %342 = vmatprep.subr.bf16.mxu1 %v403_v7 }
  0x1b   :  { %343 = vmatpush3.bf16.msra.mxu1 %v376_v29 }
  0x1c   :  { %344 = vmatprep.subr.bf16.mxu1 %v403_v7 }
  0x1f   :  { %345 = vmatpush3.bf16.msra.mxu1 %v377_v30 }
  0x20   :  { %346 = vmatprep.subr.bf16.mxu1 %v403_v7 }
  0x23   :  { %347 = vmatpush3.bf16.msra.mxu1 %v378_v31 }
  0x78   :  { %v359_v15 = vpop.permute.xlu0 %358 }
  0x79   :  { %v361_v16 = vunpack.i.h.bf16 %v359_v15  ;;  %v360_v17 = vunpack.i.l.bf16 %v359_v15 }
  0x7b   :  { %v46_v21 = vsel %vm44_vm1, %v23_v1, %v361_v16  ;;  %v45_v22 = vsel %vm44_vm1, %v22_v0, %v360_v17 }
  0x7c   :  { %v364_v18 = vpop.permute.xlu0 %363 }
  0x7d   :  { %v366_v19 = vunpack.i.h.bf16 %v364_v18  ;;  %v365_v20 = vunpack.i.l.bf16 %v364_v18 }
  0x7f   :  { %v48_v23 = vsel %vm47_vm2, %v45_v22, %v365_v20  ;;  %v49_v24 = vsel %vm47_vm2, %v46_v21, %v366_v19 }
  0x80   :  { %v50_v25 = vpack.c.bf16 %v49_v24, %v48_v23 }
  0x82   :  { %333 = vmatmul.mubr.msk.bf16.vlgmr.msra.gmra.mrb[0].mxu0 %vm106_vm3, %v50_v25 }
 0x155   :  { %v144_v33 = vpop.f32.mrb[0].mxu0 }
 0x156   :  { %v145_v34 = vadd.f32 %v290_v32, %v144_v33  ;;  %v334_v35 = vpop.f32.mrb[1].mxu0 }
 0x157   :  { %v147_v36 = vpop.f32.mrb[2].mxu0 }
 0x158   :  { %v151_v37 = vmax.f32 %v145_v34, 0.0  ;;  %v148_v38 = vadd.f32 %v290_v32, %v147_v36  ;;  %v335_v39 = vpop.f32.mrb[3].mxu0 }
 0x15a   :  { %v153_v40 = vsel %vm106_vm3, %v151_v37, -inf  ;;  %v152_v41 = vmax.f32 %v148_v38, 0.0 }
 0x15b   :  { %v154_v42 = vrot.slane %v153_v40, 4 }
 0x15c   :  { %v160_v43 = vsel %vm106_vm3, %v152_v41, -inf }
 0x15d   :  { %v155_v44 = vmax.f32 %v153_v40, %v154_v42  ;;  %v161_v45 = vrot.slane %v160_v43, 4 }
 0x15f   :  { %v156_v46 = vrot.slane %v155_v44, 2  ;;  %v162_v47 = vmax.f32 %v160_v43, %v161_v45 }
 0x161   :  { %v157_v48 = vmax.f32 %v155_v44, %v156_v46  ;;  %v163_v49 = vrot.slane %v162_v47, 2 }
 0x163   :  { %v158_v50 = vrot.slane %v157_v48, 1  ;;  %v164_v51 = vmax.f32 %v162_v47, %v163_v49 }
 0x165   :  { %v159_v52 = vmax.f32 %v157_v48, %v158_v50  ;;  %v165_v53 = vrot.slane %v164_v51, 1 }
 0x167   :  { %v167_v54 = vpack.c.bf16 %v159_v52, %v159_v52  ;;  %v166_v55 = vmax.f32 %v164_v51, %v165_v53 }
 0x169   :  { %v168_v56 = vpack.c.bf16 %v166_v55, %v166_v55  ;;  %v190_v57 = vunpack.c.l.b16 %v167_v54 }
 0x16b   :  { %v191_v58 = vunpack.c.l.b16 %v168_v56 }
 0x16d   :  { %v193_v59 = vsel %vm192_vm4, %v191_v58, %v190_v57 }
 0x16e   :  { %v194_v60 = vpack.c.b16 %v193_v59, %v193_v59 }
 0x170   :  { %349 = vmatmul.mubr.msk.bf16.vlgmr.msra.gmra.mrb[0].mxu1 %vm106_vm3, %v194_v60 }
 0x243   :  { %v268_v62 = vpop.f32.mrb[0].mxu1 }
 0x244   :  { %v269_v63 = vadd.f32 %v298_v61, %v268_v62  ;;  %v350_v0 = vpop.f32.mrb[1].mxu1 }
 0x245   :  { %v271_v1 = vpop.f32.mrb[2].mxu1 }
 0x246   :  { %v351_v2 = vpop.f32.mrb[3].mxu1  ;;  %275 = vst.msk [vmem:[#allocation2] sm:$0x3] %vm274_vm5, %v269_v63 }
 0x247   :  { %390 = shalt.err (!%p387_p4)
}
 0x248   :  { %s391_s4 = scalar_lea.hbm %s507_s5, 32 }
 0x249   :  { %p392_p5 = scmp.ne.s32.totalorder %s507_s5, %s391_s4  ;;  %p395_p6 = scmp.lt.u32.totalorder %s391_s4, %s507_s5 }
 0x24b   :  { %p397_p7 = pnand %p395_p6, %p392_p5 }
 0x24d   :  { %400 = shalt.err (!%p397_p7)
}
 0x24e   :  { %285 = dma.vmem_to_hbm [thread:$0]  %s283_s24, 32, %s507_s5, [#allocation3]  }
 0x24f   :  { %401 = dma.done.wait [#allocation3], 32  }
 0x250   :  { %402 = vsyncadd [#allocation3], 4294967264 }
 0x251   :  { %289 = vsyncpa [#allocation3], 1 }

</bundles_post_ra>
